<compile_context>
chip_gen: v6e
topology: v6e:2x2x1
jax: 0.10.0
libtpu: 0.0.40
codegen_flags: <defaults>
</compile_context>

<pallas_src>
import functools
import math

import jax
import jax.numpy as jnp
from jax.experimental import pallas as pl
from jax.experimental.pallas import tpu as pltpu


def _round_up(x, m):
    return ((x + m - 1) // m) * m


def _pick_tile(requested, n_pad):
    """Largest multiple of 128 that is <= requested and divides n_pad."""
    t = max(128, min(requested, n_pad))
    t = (t // 128) * 128
    while n_pad % t:
        t -= 128
    return t


def _vmem_limit_bytes():
    """Per-generation scoped-VMEM limit with headroom (v7x only has 64 MiB)."""
    try:
        cap = pltpu.get_tpu_info().vmem_capacity_bytes
    except Exception:  # pragma: no cover - conservative fallback
        cap = 64 * 1024 * 1024
    return min(int(cap * 3 // 4), 96 * 1024 * 1024)


# ---------------------------------------------------------------------------
# Kernel 1: XW = X @ W1  (computed once, row-tiled; bf16 out, f32 accumulate)
# ---------------------------------------------------------------------------
def _xw_kernel(x_ref, w1_ref, xw_ref):
    xw_ref[...] = jnp.dot(
        x_ref[...], w1_ref[...], preferred_element_type=jnp.float32
    ).astype(xw_ref.dtype)


# ---------------------------------------------------------------------------
# Kernel 2: logits = ReLU(A @ XW + b1) @ W2 + b2
#   grid = (rows i [parallel], contraction k [arbitrary])
#   acc_ref accumulates A@XW in f32; bias+ReLU+classifier fused on last k.
#   If xw_resident, xw_ref holds the whole (n_pad, h_pad) matrix in VMEM and
#   we slice the k-block in-kernel; otherwise xw_ref is the (tk, h_pad) block.
# ---------------------------------------------------------------------------
def _gcn_head_kernel(a_ref, xw_ref, w2_ref, b1_ref, b2_ref, o_ref, acc_ref,
                     *, tk, xw_resident):
    k = pl.program_id(1)

    @pl.when(k == 0)
    def _():
        acc_ref[...] = jnp.zeros_like(acc_ref)

    if xw_resident:
        start = pl.multiple_of(k * tk, 128)
        xw_blk = xw_ref[pl.ds(start, tk), :]
    else:
        xw_blk = xw_ref[...]

    acc_ref[...] += jnp.dot(
        a_ref[...], xw_blk, preferred_element_type=jnp.float32
    )

    @pl.when(k == pl.num_programs(1) - 1)
    def _():
        # f32 elementwise epilogue + f32 head matmul (tiny, resident W2).
        encoded = jnp.maximum(acc_ref[...] + b1_ref[...], 0.0)
        logits = jnp.dot(
            encoded, w2_ref[...], preferred_element_type=jnp.float32
        ) + b2_ref[...]
        o_ref[...] = logits.astype(o_ref.dtype)


def combined_model_forward(a, x, w1, b1, w2, b2, *, tm=512, tk=512):
    n, f = x.shape
    h = w1.shape[1]
    c = w2.shape[1]

    # Lane-dense padding of all trailing dims to multiples of 128; N is padded
    # only to 128 (quadratic in A), then tiles are chosen to divide n_pad.
    f_pad = _round_up(f, 128)
    h_pad = _round_up(h, 128)
    c_pad = _round_up(c, 128)
    n_pad = _round_up(n, 128)
    tm = _pick_tile(tm, n_pad)
    tk = _pick_tile(tk, n_pad)

    vmem_limit = _vmem_limit_bytes()

    def pad_to(arr, rows, cols, dtype):
        out = jnp.zeros((rows, cols), dtype=dtype)
        return out.at[: arr.shape[0], : arr.shape[1]].set(arr.astype(dtype))

    # bf16 for the streamed / large MXU operands, f32 for the tiny head weights
    # and biases (epilogue stays f32).
    a_p = pad_to(a, n_pad, n_pad, jnp.bfloat16)
    x_p = pad_to(x, n_pad, f_pad, jnp.bfloat16)
    w1_p = pad_to(w1, f_pad, h_pad, jnp.bfloat16)
    w2_p = pad_to(w2, h_pad, c_pad, jnp.float32)
    b1_p = pad_to(b1, 1, h_pad, jnp.float32)
    b2_p = pad_to(b2, 1, c_pad, jnp.float32)

    # ---- phase 1: XW = X @ W1, computed once (row-tiled) --------------------
    xw = pl.pallas_call(
        _xw_kernel,
        out_shape=jax.ShapeDtypeStruct((n_pad, h_pad), jnp.bfloat16),
        grid_spec=pltpu.PrefetchScalarGridSpec(
            num_scalar_prefetch=0,
            grid=(n_pad // tm,),
            in_specs=[
                pl.BlockSpec((tm, f_pad), lambda i: (i, 0)),
                pl.BlockSpec((f_pad, h_pad), lambda i: (0, 0)),
            ],
            out_specs=pl.BlockSpec((tm, h_pad), lambda i: (i, 0)),
        ),
        compiler_params=pltpu.CompilerParams(
            dimension_semantics=("parallel",),
            vmem_limit_bytes=vmem_limit,
        ),
    )(x_p, w1_p)

    # ---- phase 2: A @ XW accumulate + fused bias/ReLU/classifier epilogue ---
    # Decide whether XW can stay fully VMEM-resident (DMA'd once) in phase 2.
    bytes_fixed = (
        2 * tm * tk * 2            # A tiles (bf16, double-buffered)
        + 2 * h_pad * c_pad * 4    # W2 (resident, f32)
        + 2 * h_pad * 4            # b1
        + 2 * c_pad * 4            # b2
        + 2 * tm * c_pad * 4       # output tiles
        + tm * h_pad * 4           # f32 accumulator scratch
    )
    xw_resident = bytes_fixed + 2 * n_pad * h_pad * 2 <= int(vmem_limit * 0.7)

    if xw_resident:
        xw_spec = pl.BlockSpec((n_pad, h_pad), lambda i, k: (0, 0))
    else:
        xw_spec = pl.BlockSpec((tk, h_pad), lambda i, k: (k, 0))

    kernel = functools.partial(_gcn_head_kernel, tk=tk, xw_resident=xw_resident)

    logits_p = pl.pallas_call(
        kernel,
        out_shape=jax.ShapeDtypeStruct((n_pad, c_pad), jnp.float32),
        grid_spec=pltpu.PrefetchScalarGridSpec(
            num_scalar_prefetch=0,
            grid=(n_pad // tm, n_pad // tk),
            in_specs=[
                pl.BlockSpec((tm, tk), lambda i, k: (i, k)),        # A (streamed)
                xw_spec,                                            # XW (resident or per-k)
                pl.BlockSpec((h_pad, c_pad), lambda i, k: (0, 0)),  # W2 (resident)
                pl.BlockSpec((1, h_pad), lambda i, k: (0, 0)),      # b1 (resident)
                pl.BlockSpec((1, c_pad), lambda i, k: (0, 0)),      # b2 (resident)
            ],
            out_specs=pl.BlockSpec((tm, c_pad), lambda i, k: (i, 0)),
            scratch_shapes=[pltpu.VMEM((tm, h_pad), jnp.float32)],
        ),
        compiler_params=pltpu.CompilerParams(
            dimension_semantics=("parallel", "arbitrary"),
            vmem_limit_bytes=vmem_limit,
        ),
    )(a_p, xw, w2_p, b1_p, b2_p)

    return logits_p[:n, :c]


def reference_forward(a, x, w1, b1, w2, b2):
    encoded = jnp.maximum(a @ (x @ w1) + b1, 0.0)
    return encoded @ w2 + b2


def _make_problem(key, n, f, h, c):
    k_x, k_a, k_w1, k_b1, k_w2, k_b2 = jax.random.split(key, 6)
    x = jax.random.normal(k_x, (n, f), dtype=jnp.float32)
    # Symmetric {0,1} adjacency with self-loops, row-normalized (GCN-style).
    raw = (jax.random.uniform(k_a, (n, n)) < 0.3).astype(jnp.float32)
    adj = jnp.clip(raw + raw.T + jnp.eye(n, dtype=jnp.float32), 0.0, 1.0)
    adj = adj / jnp.sum(adj, axis=1, keepdims=True)
    w1 = jax.random.normal(k_w1, (f, h), dtype=jnp.float32) * 0.1
    b1 = jax.random.normal(k_b1, (1, h), dtype=jnp.float32) * 0.01
    w2 = jax.random.normal(k_w2, (h, c), dtype=jnp.float32) * 0.1
    b2 = jax.random.normal(k_b2, (1, c), dtype=jnp.float32) * 0.01
    return adj, x, w1, b1, w2, b2


if __name__ == "__main__":
    key = jax.random.PRNGKey(0)
    k1, k2 = jax.random.split(key)

    # Case 1: small shapes matching the module spec (16 nodes, 32 feat,
    # 32 hidden, 4 classes) -> single-tile grid.
    N, F, H, C = 16, 32, 32, 4
    args1 = _make_problem(k1, N, F, H, C)
    out1 = jax.block_until_ready(combined_model_forward(*args1))
    ref1 = reference_forward(*args1)
    assert out1.shape == (N, C)
    assert jnp.allclose(out1, ref1, atol=2e-2, rtol=2e-2), "mismatch (small case)"

    # Case 2: non-multiple N with small explicit tiles to exercise the
    # (parallel rows x arbitrary contraction) grid, the 128-only padding,
    # the accumulator init/finalize path and the in-kernel XW slice.
    N2, F2, H2, C2 = 300, 48, 40, 10
    args2 = _make_problem(k2, N2, F2, H2, C2)
    out2 = jax.block_until_ready(
        combined_model_forward(*args2, tm=128, tk=128)
    )
    ref2 = reference_forward(*args2)
    assert out2.shape == (N2, C2)
    assert jnp.allclose(out2, ref2, atol=2e-2, rtol=2e-2), "mismatch (tiled case)"

    print("KERNEL_OK")
</pallas_src>

<mosaic_0001>
module attributes {stable_mosaic.version = 11 : i64} {
  func.func @_xw_kernel(%arg0: i32, %arg1: memref<128x128xbf16, #tpu.memory_space<vmem>>, %arg2: memref<128x128xbf16, #tpu.memory_space<vmem>>, %arg3: memref<128x128xbf16, #tpu.memory_space<vmem>>) attributes {dimension_semantics = [#tpu.dimension_semantics<parallel>], iteration_bounds = array<i64: 1>, scalar_prefetch = 0 : i64, scratch_operands = 0 : i64, tpu.core_type = #tpu.core_type<tc>, window_params = [{transform_indices = @transform_0, window_bounds = array<i64: 128, 128>}, {pipeline_mode = #tpu.pipeline_mode<synchronous>, transform_indices = @transform_1, window_bounds = array<i64: 128, 128>}, {transform_indices = @transform_2, window_bounds = array<i64: 128, 128>}]} {
    %c0 = arith.constant 0 : index
    %c0_0 = arith.constant 0 : index
    %0 = vector.load %arg1[%c0, %c0_0] : memref<128x128xbf16, #tpu.memory_space<vmem>>, vector<128x128xbf16>
    %c0_1 = arith.constant 0 : index
    %c0_2 = arith.constant 0 : index
    %1 = vector.load %arg2[%c0_1, %c0_2] : memref<128x128xbf16, #tpu.memory_space<vmem>>, vector<128x128xbf16>
    %cst = arith.constant dense<0.000000e+00> : vector<128x128xf32>
    %2 = tpu.matmul %0, %1, %cst {dimension_numbers = #tpu.dot_dimension_numbers<[1], [0], [0], [1], [0, 0, 1, 1], [], []>} : vector<128x128xbf16>, vector<128x128xbf16>, vector<128x128xf32> -> vector<128x128xf32>
    %3 = arith.truncf %2 : vector<128x128xf32> to vector<128x128xbf16>
    %c0_3 = arith.constant 0 : index
    %c0_4 = arith.constant 0 : index
    %4 = vector.load %arg3[%c0_3, %c0_4] : memref<128x128xbf16, #tpu.memory_space<vmem>>, vector<128x128xbf16>
    tpu.vector_store %arg3[%c0_3, %c0_4], %3 {strides = array<i32>} : memref<128x128xbf16, #tpu.memory_space<vmem>>, vector<128x128xbf16>,
    return
  }
  func.func @transform_0(%arg0: i32) -> (i32, i32) {
    %c0_i32 = arith.constant 0 : i32
    %c0_i32_0 = arith.constant 0 : i32
    return %arg0, %c0_i32 : i32, i32
  }
  func.func @transform_1(%arg0: i32) -> (i32, i32) {
    %c0_i32 = arith.constant 0 : i32
    %c0_i32_0 = arith.constant 0 : i32
    %c0_i32_1 = arith.constant 0 : i32
    return %c0_i32, %c0_i32_0 : i32, i32
  }
  func.func @transform_2(%arg0: i32) -> (i32, i32) {
    %c0_i32 = arith.constant 0 : i32
    %c0_i32_0 = arith.constant 0 : i32
    return %arg0, %c0_i32 : i32, i32
  }
}

</mosaic_0001>

<bundles_post_ra>
// kernel: tpu_custom_call.1
= control target key start
LH: loop header
LB: loop body
LE: loop exit
PB: predicated region body
PF: predicated region fallthrough
CT: control target
= control target key end

     0   :  { %7 = vsyncpa [#allocation3], 0  ;;  %s648_s0 = inlined_call_operand.hbm [shape: bf16[128,128], index: 0, kind: input, shape index: {}]   ;;  %s649_s1 = inlined_call_operand.hbm [shape: bf16[128,128], index: 1, kind: input, shape index: {}]   ;;  %s650_s2 = inlined_call_operand.hbm [shape: bf16[128,128], index: 2, kind: output, shape index: {}]  }
   0x1   :  { %8 = vsyncpa [#allocation6], 0 }
   0x2   :  { %9 = vsyncpa [#allocation4], 0  ;;  %s610_s9 = smov [#allocation2]  }
   0x3   :  { %s15_s10 = sshll.u32 %s610_s9, 4  ;;  %s16_s10 = int_to_ptr.vmem [resolvable:$true] %s15_s10 }
   0x4   :  { %s552_s11 = scalar_lea.vmem %s16_s10, 1024  ;;  %p557_p1 = scmp.lt.s32.totalorder %s16_s10, %s16_s10 }
   0x5   :  { %p553_p0 = scmp.ne.s32.totalorder %s16_s10, %s552_s11  ;;  %p558_p2 = scmp.lt.s32.totalorder %s552_s11, %s552_s11 }
   0x7   :  { %p559_p3 = por %p558_p2, %p557_p1 }
   0x9   :  { %p560_p4 = pnand %p559_p3, %p553_p0 }
   0xb   :  { %563 = shalt.err (!%p560_p4)
}
   0xc   :  { %s611_s12 = smov 64   ;;  %s612_s13 = smov 4  }
   0xd   :  { %21 = dma.hbm_to_vmem [thread:$0]  %s648_s0, 1024, %s16_s10, [#allocation3], %s611_s12, %s611_s12, %s612_s13  }
   0xe   :  { %s613_s16 = smov [#allocation5]  }
   0xf   :  { %s27_s17 = sshll.u32 %s613_s16, 4  ;;  %s28_s17 = int_to_ptr.vmem [resolvable:$true] %s27_s17 }
  0x10   :  { %s572_s18 = scalar_lea.vmem %s28_s17, 1024  ;;  %p577_p6 = scmp.lt.s32.totalorder %s28_s17, %s28_s17 }
  0x11   :  { %p573_p5 = scmp.ne.s32.totalorder %s28_s17, %s572_s18  ;;  %p578_p7 = scmp.lt.s32.totalorder %s572_s18, %s572_s18 }
  0x13   :  { %p579_p8 = por %p578_p7, %p577_p6 }
  0x15   :  { %p580_p9 = pnand %p579_p8, %p573_p5 }
  0x17   :  { %583 = shalt.err (!%p580_p9)
}
  0x18   :  { %33 = dma.hbm_to_vmem [thread:$0]  %s649_s1, 1024, %s28_s17, [#allocation6], %s611_s12, %s611_s12, %s612_s13  }
  0x19   :  { %604 = dma.done.wait [#allocation3], 1024  }
  0x1a   :  { %605 = vsyncadd [#allocation3], 4294966272 }
  0x1b   :  { %606 = dma.done.wait [#allocation6], 1024  }
  0x1c   :  { %607 = vsyncadd [#allocation6], 4294966272  ;;  %v528_v0 = vld [vmem:[#allocation5 + $0x38] sm:$0xff]   ;;  %v529_v1 = vld [vmem:[#allocation5 + $0x30] sm:$0xff]   ;;  %s614_s0 = smov [#allocation7]  }
  0x1d   :  { %475 = vmatprep.subr.bf16.mxu0 %v528_v0  ;;  %507 = vmatprep.subr.bf16.mxu1 %v528_v0  ;;  %v530_v2 = vld [vmem:[#allocation5 + $0x28] sm:$0xff]   ;;  %v531_v3 = vld [vmem:[#allocation5 + $0x20] sm:$0xff]   ;;  %v532_v6 = vld [vmem:[#allocation5 + $0x18] sm:$0xff]   ;;  %s351_s1 = sshll.u32 %s614_s0, 4  ;;  %s352_s1 = int_to_ptr.vmem [resolvable:$true] %s351_s1 }
  0x1e   :  { %476 = vmatpush3.bf16.msra.mxu0 %v528_v0  ;;  %515 = vmatpush3.bf16.msra.mxu1 %v528_v0  ;;  %v536_v4 = vld [vmem:[#allocation2] sm:$0xff]   ;;  %v533_v7 = vld [vmem:[#allocation5 + $0x10] sm:$0xff]   ;;  %v534_v8 = vld [vmem:[#allocation5 + $0x8] sm:$0xff]   ;;  %s584_s21 = scalar_lea.vmem %s352_s1, 1024  ;;  %p589_p11 = scmp.lt.s32.totalorder %s352_s1, %s352_s1 }
  0x1f   :  { %477 = vmatprep.subr.bf16.mxu0 %v529_v1  ;;  %508 = vmatprep.subr.bf16.mxu1 %v529_v1  ;;  %v537_v5 = vld [vmem:[#allocation2 + $0x20] sm:$0xff]   ;;  %v538_v10 = vld [vmem:[#allocation2 + $0x8] sm:$0xff]   ;;  %v540_v12 = vld [vmem:[#allocation2 + $0x10] sm:$0xff]   ;;  %p585_p10 = scmp.ne.s32.totalorder %s352_s1, %s584_s21  ;;  %p590_p12 = scmp.lt.s32.totalorder %s584_s21, %s584_s21 }
  0x20   :  { %491 = vmatprep.mubr.bf16.mxu0 %v536_v4  ;;  %499 = vmatprep.mubr.bf16.mxu1 %v537_v5  ;;  %v535_v9 = vld [vmem:[#allocation5] sm:$0xff]   ;;  %v539_v11 = vld [vmem:[#allocation2 + $0x28] sm:$0xff]   ;;  %v541_v13 = vld [vmem:[#allocation2 + $0x30] sm:$0xff]  }
  0x21   :  { %v542_v14 = vld [vmem:[#allocation2 + $0x18] sm:$0xff]   ;;  %p591_p13 = por %p590_p12, %p589_p11 }
  0x22   :  { %478 = vmatpush3.bf16.msra.mxu0 %v529_v1  ;;  %516 = vmatpush3.bf16.msra.mxu1 %v529_v1  ;;  %v543_v15 = vld [vmem:[#allocation2 + $0x38] sm:$0xff]  }
  0x23   :  { %479 = vmatprep.subr.bf16.mxu0 %v530_v2  ;;  %509 = vmatprep.subr.bf16.mxu1 %v530_v2  ;;  %p592_p0 = pnand %p591_p13, %p585_p10 }
  0x26   :  { %480 = vmatpush3.bf16.msra.mxu0 %v530_v2  ;;  %517 = vmatpush3.bf16.msra.mxu1 %v530_v2 }
  0x27   :  { %481 = vmatprep.subr.bf16.mxu0 %v531_v3  ;;  %510 = vmatprep.subr.bf16.mxu1 %v531_v3 }
  0x2a   :  { %482 = vmatpush3.bf16.msra.mxu0 %v531_v3  ;;  %518 = vmatpush3.bf16.msra.mxu1 %v531_v3 }
  0x2b   :  { %483 = vmatprep.subr.bf16.mxu0 %v532_v6  ;;  %511 = vmatprep.subr.bf16.mxu1 %v532_v6 }
  0x2e   :  { %484 = vmatpush3.bf16.msra.mxu0 %v532_v6  ;;  %519 = vmatpush3.bf16.msra.mxu1 %v532_v6 }
  0x2f   :  { %485 = vmatprep.subr.bf16.mxu0 %v533_v7  ;;  %512 = vmatprep.subr.bf16.mxu1 %v533_v7 }
  0x32   :  { %486 = vmatpush3.bf16.msra.mxu0 %v533_v7  ;;  %520 = vmatpush3.bf16.msra.mxu1 %v533_v7 }
  0x33   :  { %487 = vmatprep.subr.bf16.mxu0 %v534_v8  ;;  %513 = vmatprep.subr.bf16.mxu1 %v534_v8 }
  0x36   :  { %488 = vmatpush3.bf16.msra.mxu0 %v534_v8  ;;  %521 = vmatpush3.bf16.msra.mxu1 %v534_v8 }
  0x37   :  { %489 = vmatprep.subr.bf16.mxu0 %v535_v9  ;;  %514 = vmatprep.subr.bf16.mxu1 %v535_v9 }
  0x3a   :  { %490 = vmatpush3.bf16.msra.mxu0 %v535_v9  ;;  %522 = vmatpush3.bf16.msra.mxu1 %v535_v9 }
  0x3d   :  { %492 = vmatmul.mubr.bf16.vlgmr.msra.gmra.mxu0 %v538_v10  ;;  %500 = vmatmul.mubr.bf16.vlgmr.msra.gmra.mxu1 %v539_v11 }
  0x3e   :  { %495 = vmatprep.mubr.bf16.mxu0 %v540_v12  ;;  %503 = vmatprep.mubr.bf16.mxu1 %v541_v13 }
  0x45   :  { %496 = vmatmul.mubr.bf16.gmra.mxu0 %v542_v14  ;;  %504 = vmatmul.mubr.bf16.gmra.mxu1 %v543_v15 }
  0xfd   :  { %v493_v16 = vpop.f32.mrf.mxu0  ;;  %v501_v17 = vpop.f32.mrf.mxu1 }
  0xff   :  { %v203_v18 = vpop.f32.mrf.mxu0  ;;  %v235_v19 = vpop.f32.mrf.mxu1 }
 0x101   :  { %v494_v20 = vpop.f32.mrf.mxu0  ;;  %v502_v21 = vpop.f32.mrf.mxu1 }
 0x102   :  { %v420_v22 = vpack.c.bf16 %v494_v20, %v493_v16  ;;  %v440_v23 = vpack.c.bf16 %v502_v21, %v501_v17 }
 0x103   :  { %v206_v24 = vpop.f32.mrf.mxu0  ;;  %v238_v25 = vpop.f32.mrf.mxu1 }
 0x104   :  { %452 = vst [vmem:[#allocation7 + $0x8] sm:$0xff] %v420_v22   ;;  %456 = vst [vmem:[#allocation7 + $0x28] sm:$0xff] %v440_v23   ;;  %v415_v26 = vpack.c.bf16 %v206_v24, %v203_v18  ;;  %v435_v27 = vpack.c.bf16 %v238_v25, %v235_v19 }
 0x105   :  { %v497_v28 = vpop.f32.mrf.mxu0  ;;  %v505_v29 = vpop.f32.mrf.mxu1 }
 0x106   :  { %416 = vst [vmem:[#allocation7] sm:$0xff] %v415_v26   ;;  %455 = vst [vmem:[#allocation7 + $0x20] sm:$0xff] %v435_v27  }
 0x107   :  { %v219_v30 = vpop.f32.mrf.mxu0  ;;  %v251_v31 = vpop.f32.mrf.mxu1 }
 0x109   :  { %v498_v32 = vpop.f32.mrf.mxu0  ;;  %v506_v33 = vpop.f32.mrf.mxu1 }
 0x10a   :  { %v430_v34 = vpack.c.bf16 %v498_v32, %v497_v28  ;;  %v450_v35 = vpack.c.bf16 %v506_v33, %v505_v29 }
 0x10b   :  { %v222_v36 = vpop.f32.mrf.mxu0  ;;  %v254_v37 = vpop.f32.mrf.mxu1 }
 0x10c   :  { %454 = vst [vmem:[#allocation7 + $0x18] sm:$0xff] %v430_v34   ;;  %458 = vst [vmem:[#allocation7 + $0x38] sm:$0xff] %v450_v35   ;;  %v425_v38 = vpack.c.bf16 %v222_v36, %v219_v30  ;;  %v445_v39 = vpack.c.bf16 %v254_v37, %v251_v31 }
 0x10e   :  { %453 = vst [vmem:[#allocation7 + $0x10] sm:$0xff] %v425_v38   ;;  %457 = vst [vmem:[#allocation7 + $0x30] sm:$0xff] %v445_v39  }
 0x10f   :  { %595 = shalt.err (!%p592_p0)
}
 0x110   :  { %357 = dma.vmem_to_hbm [thread:$0]  %s352_s1, 1024, %s650_s2, [#allocation4], %s611_s12, %s611_s12, %s612_s13  }
 0x111   :  { %608 = dma.done.wait [#allocation4], 1024  }
 0x112   :  { %609 = vsyncadd [#allocation4], 4294966272 }
 0x113   :  { %361 = vsyncpa [#allocation3], 1 }
 0x114   :  { %362 = vsyncpa [#allocation6], 1 }
 0x115   :  { %363 = vsyncpa [#allocation4], 1 }

</bundles_post_ra>
